<compile_context>
chip_gen: v5e
topology: v5e:2x2
jax: 0.10.0
libtpu: 0.0.40
codegen_flags: <defaults>
</compile_context>

<pallas_src>
import functools

import jax
import jax.numpy as jnp
from jax.experimental import pallas as pl
from jax.experimental.pallas import tpu as pltpu


def _round_up(x, m):
    return -(-x // m) * m


def _firstpos_kernel(cov_ref, sigma_ref):
    # Block of the flat covariance buffer: (tr, 128) f32.  Global flat index of an
    # element is row*128 + lane, so its 2x2 component is lane % 4:
    #   lane%4 == 0 -> c00, 1 -> c01 (ignored by tril), 2 -> c10, 3 -> c11.
    x = cov_ref[...]

    # Per-lane component masks, computed once at (1, 128) and broadcast over sublanes.
    lane8 = jax.lax.broadcasted_iota(jnp.int32, (8, 128), 1)
    comp = lane8[0:1, :] & 3
    m1 = comp == 1                      # Sigma01 lanes
    m3 = comp == 3                      # Sigma11 lanes
    diag = (comp == 0) | m3             # diagonal (softplus) lanes

    # Roll-direction probe: fwd is True iff pltpu.roll(v, 1, axis=1)[i] == v[i-1]
    # (jnp.roll convention).  Used so the kernel is correct under either rotate
    # convention; costs one (8, 128) roll per grid step.
    fwd = (pltpu.roll(lane8, 1, axis=1) == lane8 - 1)[0:1, :]

    # Cholesky factor entries in place: numerically stable softplus, computed dense
    # (full vregs) and selected onto the diagonal lanes; off-diagonals keep raw values.
    sp = jnp.maximum(x, 0.0) + jnp.log1p(jnp.exp(-jnp.abs(x)))
    d = jnp.where(diag, sp, x)          # per point: [l00, c01, c10, l11]

    # Neighbour values along the lane axis (XLU rotates).  Wraparound at the row edge
    # only ever lands on lanes that the masks below ignore (4 divides 128, so a point's
    # four components never straddle a row).
    r_p1 = pltpu.roll(d, 1, axis=1)     # candidate "value from lane-1"
    r_m1 = pltpu.roll(d, 127, axis=1)   # candidate "value from lane+1" (== shift -1 mod 128)
    r_p2 = pltpu.roll(d, 2, axis=1)
    r_m2 = pltpu.roll(d, 126, axis=1)
    from1 = jnp.where(fwd, r_p1, r_m1)  # value from lane-1, either convention
    from2 = jnp.where(fwd, r_p2, r_m2)  # value from lane-2, either convention

    # Sigma = L @ L.T for L = [[l00, 0], [c10, l11]]:
    #   lane 0: Sigma00 = l00^2                 = d^2
    #   lane 1: Sigma01 = l00 * c10             = d[lane-1] * d[lane+1]  (direction-symmetric)
    #   lane 2: Sigma10 = l00 * c10             = from2 * d
    #   lane 3: Sigma11 = c10^2 + l11^2         = from1^2 + d^2
    q = d * d
    s_diag = q + jnp.where(m3, from1 * from1, 0.0)
    s_off = jnp.where(m1, r_p1 * r_m1, from2 * d)
    sigma_ref[...] = jnp.where(diag, s_diag, s_off)


@functools.partial(jax.jit, static_argnames=("tile_rows",))
def firstpos_forward(loc, cov, *, tile_rows=4096):
    """Returns (mean, Sigma): the defining parameters of every per-point posterior MVN."""
    P, D = loc.shape
    assert D == 2 and cov.shape == (P, D, D)

    n = P * 4
    flat = cov.astype(jnp.float32).reshape(n)        # contiguous -> free
    n_pad = _round_up(n, 128)
    if n_pad != n:                                   # only when P % 32 != 0
        flat = jnp.pad(flat, (0, n_pad - n))
    rows = n_pad // 128
    cov2d = flat.reshape(rows, 128)                  # contiguous -> free

    # Row tiling: tr % 8 == 0 blocks, at least 2 grid blocks when possible (v7x
    # megacore), ragged last block handled by Pallas masking (bounds padding waste).
    if rows <= 8:
        tr = rows
    else:
        tr = min(tile_rows, _round_up(pl.cdiv(rows, 2), 8))
    grid = (pl.cdiv(rows, tr),)

    sigma2d = pl.pallas_call(
        _firstpos_kernel,
        out_shape=jax.ShapeDtypeStruct((rows, 128), jnp.float32),
        grid=grid,
        in_specs=[pl.BlockSpec((tr, 128), lambda i: (i, 0))],
        out_specs=pl.BlockSpec((tr, 128), lambda i: (i, 0)),
        compiler_params=pltpu.CompilerParams(
            dimension_semantics=("parallel",),
        ),
    )(cov2d)

    sigma_flat = sigma2d.reshape(rows * 128)
    if n_pad != n:
        sigma_flat = sigma_flat[:n]
    sigma = sigma_flat.reshape(P, 2, 2)              # contiguous -> free
    # The mean of each posterior is just the loc parameter; no kernel work needed.
    return loc, sigma


def firstpos_forward_ref(loc, cov):
    """Pure-JAX reference of the same math."""
    D = loc.shape[1]
    cov = cov.astype(jnp.float32)
    eye = jnp.eye(D, dtype=jnp.float32)
    L = jnp.tril(eye * jax.nn.softplus(cov) + (1.0 - eye) * cov)
    sigma = jnp.einsum("pik,pjk->pij", L, L)
    return loc, sigma


if __name__ == "__main__":
    point_num, dim = 8, 2

    key = jax.random.PRNGKey(0)
    # parameters, initialized as FirstPos.__init__ would (randn loc, identity covariance)
    loc = jax.random.normal(key, (point_num, dim), dtype=jnp.float32)
    covariance = jnp.tile(jnp.eye(dim, dtype=jnp.float32)[None], (point_num, 1, 1))
    # perturb covariance a bit so off-diagonal / softplus paths are exercised
    covariance = covariance + 0.1 * jax.random.normal(
        jax.random.PRNGKey(1), (point_num, dim, dim), dtype=jnp.float32
    )

    mean, sigma = firstpos_forward(loc, covariance)
    jax.block_until_ready((mean, sigma))

    mean_ref, sigma_ref = firstpos_forward_ref(loc, covariance)
    assert jnp.allclose(mean, mean_ref, atol=1e-5, rtol=1e-5)
    assert jnp.allclose(sigma, sigma_ref, atol=1e-5, rtol=1e-5)

    # Multi-row / multi-block and ragged-last-block coverage (still small shapes).
    for pn in (2048, 1056):
        loc2 = jax.random.normal(jax.random.PRNGKey(2), (pn, dim), dtype=jnp.float32)
        cov2 = jax.random.normal(jax.random.PRNGKey(3), (pn, dim, dim), dtype=jnp.float32)
        _, s2 = firstpos_forward(loc2, cov2, tile_rows=16)  # force several grid blocks
        jax.block_until_ready(s2)
        _, s2_ref = firstpos_forward_ref(loc2, cov2)
        assert jnp.allclose(s2, s2_ref, atol=1e-5, rtol=1e-5)

    # TODO(synk): the torch.distributions.MultivariateNormal wrapper objects themselves
    # (and kl.kl_divergence in prior_loss) have no Pallas equivalent; the kernel emits
    # their defining parameters (mean, covariance) instead.
    print("KERNEL_OK")
</pallas_src>

<mosaic_0001>
module attributes {stable_mosaic.version = 11 : i64} {
  func.func @_firstpos_kernel(%arg0: i32, %arg1: memref<1x128xf32, #tpu.memory_space<vmem>>, %arg2: memref<1x128xf32, #tpu.memory_space<vmem>>) attributes {dimension_semantics = [#tpu.dimension_semantics<parallel>], iteration_bounds = array<i64: 1>, scalar_prefetch = 0 : i64, scratch_operands = 0 : i64, tpu.core_type = #tpu.core_type<tc>, window_params = [{transform_indices = @transform_0, window_bounds = array<i64: 1, 128>}, {transform_indices = @transform_1, window_bounds = array<i64: 1, 128>}]} {
    %c0 = arith.constant 0 : index
    %c0_0 = arith.constant 0 : index
    %0 = vector.load %arg1[%c0, %c0_0] : memref<1x128xf32, #tpu.memory_space<vmem>>, vector<1x128xf32>
    %1 = tpu.iota {dimensions = array<i32: 1>} : vector<8x128xi32>
    %2 = vector.extract_strided_slice %1 {offsets = [0, 0], sizes = [1, 128], strides = [1, 1]} : vector<8x128xi32> to vector<1x128xi32>
    %c3_i32 = arith.constant 3 : i32
    %3 = vector.broadcast %c3_i32 : i32 to vector<1x128xi32>
    %4 = arith.andi %2, %3 : vector<1x128xi32>
    %c1_i32 = arith.constant 1 : i32
    %5 = vector.broadcast %c1_i32 : i32 to vector<1x128xi32>
    %6 = arith.cmpi eq, %4, %5 : vector<1x128xi32>
    %c3_i32_1 = arith.constant 3 : i32
    %7 = vector.broadcast %c3_i32_1 : i32 to vector<1x128xi32>
    %8 = arith.cmpi eq, %4, %7 : vector<1x128xi32>
    %c0_i32 = arith.constant 0 : i32
    %9 = vector.broadcast %c0_i32 : i32 to vector<1x128xi32>
    %10 = arith.cmpi eq, %4, %9 : vector<1x128xi32>
    %11 = arith.ori %10, %8 : vector<1x128xi1>
    %c1_i32_2 = arith.constant 1 : i32
    %12 = tpu.dynamic_rotate %1 by %c1_i32_2 dim 1 : vector<8x128xi32>, i32 -> vector<8x128xi32>
    %c1_i32_3 = arith.constant 1 : i32
    %13 = vector.broadcast %c1_i32_3 : i32 to vector<8x128xi32>
    %14 = arith.subi %1, %13 : vector<8x128xi32>
    %15 = arith.cmpi eq, %12, %14 : vector<8x128xi32>
    %16 = vector.extract_strided_slice %15 {offsets = [0, 0], sizes = [1, 128], strides = [1, 1]} : vector<8x128xi1> to vector<1x128xi1>
    %cst = arith.constant 0.000000e+00 : f32
    %17 = vector.broadcast %cst : f32 to vector<1x128xf32>
    %18 = arith.maximumf %0, %17 : vector<1x128xf32>
    %19 = math.absf %0 : vector<1x128xf32>
    %cst_4 = arith.constant 0.000000e+00 : f32
    %20 = vector.broadcast %cst_4 : f32 to vector<1x128xf32>
    %21 = arith.subf %20, %19 : vector<1x128xf32>
    %22 = math.exp %21 : vector<1x128xf32>
    %23 = math.log1p %22 : vector<1x128xf32>
    %24 = arith.addf %18, %23 : vector<1x128xf32>
    %25 = arith.select %11, %24, %0 : vector<1x128xi1>, vector<1x128xf32>
    %c1_i32_5 = arith.constant 1 : i32
    %26 = tpu.dynamic_rotate %25 by %c1_i32_5 dim 1 : vector<1x128xf32>, i32 -> vector<1x128xf32>
    %c127_i32 = arith.constant 127 : i32
    %27 = tpu.dynamic_rotate %25 by %c127_i32 dim 1 : vector<1x128xf32>, i32 -> vector<1x128xf32>
    %c2_i32 = arith.constant 2 : i32
    %28 = tpu.dynamic_rotate %25 by %c2_i32 dim 1 : vector<1x128xf32>, i32 -> vector<1x128xf32>
    %c126_i32 = arith.constant 126 : i32
    %29 = tpu.dynamic_rotate %25 by %c126_i32 dim 1 : vector<1x128xf32>, i32 -> vector<1x128xf32>
    %30 = arith.select %16, %26, %27 : vector<1x128xi1>, vector<1x128xf32>
    %31 = arith.select %16, %28, %29 : vector<1x128xi1>, vector<1x128xf32>
    %32 = arith.mulf %25, %25 : vector<1x128xf32>
    %33 = arith.mulf %30, %30 : vector<1x128xf32>
    %cst_6 = arith.constant 0.000000e+00 : f32
    %34 = vector.broadcast %cst_6 : f32 to vector<1x128xf32>
    %35 = arith.select %8, %33, %34 : vector<1x128xi1>, vector<1x128xf32>
    %36 = arith.addf %32, %35 : vector<1x128xf32>
    %37 = arith.mulf %26, %27 : vector<1x128xf32>
    %38 = arith.mulf %31, %25 : vector<1x128xf32>
    %39 = arith.select %6, %37, %38 : vector<1x128xi1>, vector<1x128xf32>
    %40 = arith.select %11, %36, %39 : vector<1x128xi1>, vector<1x128xf32>
    %c0_7 = arith.constant 0 : index
    %c0_8 = arith.constant 0 : index
    %41 = vector.load %arg2[%c0_7, %c0_8] : memref<1x128xf32, #tpu.memory_space<vmem>>, vector<1x128xf32>
    tpu.vector_store %arg2[%c0_7, %c0_8], %40 {strides = array<i32>} : memref<1x128xf32, #tpu.memory_space<vmem>>, vector<1x128xf32>,
    return
  }
  func.func @transform_0(%arg0: i32) -> (i32, i32) {
    %c0_i32 = arith.constant 0 : i32
    %c0_i32_0 = arith.constant 0 : i32
    return %arg0, %c0_i32 : i32, i32
  }
  func.func @transform_1(%arg0: i32) -> (i32, i32) {
    %c0_i32 = arith.constant 0 : i32
    %c0_i32_0 = arith.constant 0 : i32
    return %arg0, %c0_i32 : i32, i32
  }
}

</mosaic_0001>

<bundles_post_ra>
// kernel: firstpos_forward.1
= control target key start
LH: loop header
LB: loop body
LE: loop exit
PB: predicated region body
PF: predicated region fallthrough
CT: control target
= control target key end

     0   :  { %v9_v0 = vlaneseq  ;;  %s68_s8 = smov 1   ;;  %s70_s9 = smov 126   ;;  %s98_s0 = inlined_call_operand.vmem [shape: f32[1,128], index: 0, kind: input, shape index: {}]   ;;  %s99_s1 = inlined_call_operand.vmem [shape: f32[1,128], index: 1, kind: output, shape index: {}]  }
   0x1   :  { %v8_v1 = vld [vmem:[%s98_s0] sm:$0x1]  ;;  %s69_s0 = smov 127   ;;  %s71_s10 = smov 2  }
   0x2   :  { %v10_v2 = vand.u32 127, %v9_v0  ;;  %v21_v3 = vand.u32 2147483647, %v8_v1  ;;  %v20_v14 = vmax.f32 %v8_v1, 0.0 }
   0x4   :  { %16 = vrot.lane.b32.xlu0 %v10_v2, %s68_s8  ;;  %v22_v4 = vsub.f32 0.0, %v21_v3  ;;  %v11_v10 = vand.u32 3, %v10_v2  ;;  %v59_v21 = vadd.s32 4294967295, %v10_v2 }
   0x6   :  { %v23_v5 = vmul.f32 1.442695, %v22_v4  ;;  %vm13_vm0 = vcmp.eq.s32.totalorder %v11_v10, 3  ;;  %vm14_vm1 = vcmp.eq.s32.totalorder %v11_v10, 0  ;;  %vm12_vm5 = vcmp.eq.s32.totalorder %v11_v10, 1 }
   0x7   :  { %vm86_vm3 = vmor %vm14_vm1, %vm13_vm0 }
   0x8   :  { %64 = vpow2.f32 %v23_v5 }
   0xe   :  { %v65_v6 = vpop.eup %64 }
   0xf   :  { %v25_v7 = vadd.f32 1.0, %v65_v6  ;;  %v28_v8 = vmul.f32 -0.5, %v65_v6  ;;  %v31_v11 = vand.u32 2147483647, %v65_v6 }
  0x11   :  { %66 = vlog2.f32 %v25_v7  ;;  %v29_v9 = vadd.f32 1.0, %v28_v8  ;;  %vm32_vm2 = vcmp.lt.f32.partialorder %v31_v11, 0.0004427343 }
  0x13   :  { %v30_v12 = vmul.f32 %v65_v6, %v29_v9 }
  0x17   :  { %v67_v13 = vpop.eup %66 }
  0x18   :  { %v27_v15 = vmul.f32 0.6931472, %v67_v13 }
  0x1a   :  { %v33_v17 = vsel %vm32_vm2, %v30_v12, %v27_v15 }
  0x1b   :  { %v34_v18 = vadd.f32 %v33_v17, %v20_v14 }
  0x1d   :  { %v35_v19 = vsel %vm86_vm3, %v34_v18, %v8_v1 }
  0x1e   :  { %38 = vrot.lane.b32.xlu1 %v35_v19, %s69_s0  ;;  %36 = vrot.lane.b32.xlu0 %v35_v19, %s68_s8  ;;  %v46_v27 = vmul.f32 %v35_v19, %v35_v19 }
  0x1f   :  { %42 = vrot.lane.b32.xlu2 %v35_v19, %s70_s9 }
  0x26   :  { %40 = vrot.lane.b32.xlu1 %v35_v19, %s71_s10 }
  0x76   :  { %v17_v20 = vpop.permute.xlu0 %16 }
  0x77   :  { %vm19_vm4 = vcmp.eq.s32.totalorder %v17_v20, %v59_v21 }
  0x79   :  { %v43_v26 = vpop.permute.xlu2 %42 }
  0x90   :  { %v39_v22 = vpop.permute.xlu1 %38  ;;  %v37_v23 = vpop.permute.xlu0 %36 }
  0x91   :  { %v44_v24 = vsel %vm19_vm4, %v37_v23, %v39_v22  ;;  %v50_v31 = vmul.f32 %v39_v22, %v37_v23 }
  0x92   :  { %v47_v25 = vmul.f32 %v44_v24, %v44_v24 }
  0x94   :  { %v48_v28 = vsel %vm13_vm0, %v47_v25, 0.0 }
  0x95   :  { %v49_v33 = vadd.f32 %v48_v28, %v46_v27 }
  0x98   :  { %v41_v29 = vpop.permute.xlu1 %40 }
  0x99   :  { %v45_v30 = vsel %vm19_vm4, %v41_v29, %v43_v26 }
  0x9a   :  { %v51_v32 = vmul.f32 %v45_v30, %v35_v19 }
  0x9c   :  { %v52_v34 = vsel %vm12_vm5, %v50_v31, %v51_v32 }
  0x9d   :  { %v53_v35 = vsel %vm86_vm3, %v49_v33, %v52_v34 }
  0x9e   :  { %54 = vst [vmem:[%s99_s1] sm:$0x1] %v53_v35 }

</bundles_post_ra>
